<compile_context>
chip_gen: v7x
topology: tpu7x:2x2x1
jax: 0.10.0
libtpu: 0.0.40
codegen_flags: <defaults>
</compile_context>

<pallas_src>
import functools

import jax
import jax.numpy as jnp
from jax.experimental import pallas as pl
from jax.experimental.pallas import tpu as pltpu


def _upsample_conv_kernel(body_ref, h0_ref, h1_ref, w_ref, b_ref, o_ref):
    """Fused nearest-2x upsample + 3x3 'same' conv for one row block.

    body_ref: (1, tHi, W+2, Cin)  rows [g*tHi, (g+1)*tHi) of the padded input
    h0_ref  : (1, 1,   W+2, Cin)  halo row (g+1)*tHi
    h1_ref  : (1, 1,   W+2, Cin)  halo row (g+1)*tHi + 1
    w_ref   : (9*Cin, 4*Cout)     parity-fused im2col weights
    b_ref   : (1, 4*Cout)         bias tiled over the 4 output parities
    o_ref   : (1, tHi, W, 4*Cout) parity-packed conv output
    """
    tHi = o_ref.shape[1]
    W = o_ref.shape[2]
    Co4 = o_ref.shape[3]
    Cin = body_ref.shape[3]

    # (tHi+2, W+2, Cin) window of the zero-padded original-resolution input.
    xw = jnp.concatenate([body_ref[0], h0_ref[0], h1_ref[0]], axis=0)

    # im2col slab built once per tile: 9 shifted taps along the contraction axis.
    taps = [xw[p:p + tHi, q:q + W, :] for p in range(3) for q in range(3)]
    patch = jnp.concatenate(taps, axis=-1)            # (tHi, W, 9*Cin)
    patch = patch.reshape(tHi * W, 9 * Cin)           # tile-aligned merge

    # Single MXU matmul: K = 9*Cin, N = 4*Cout (all four output parities at once).
    acc = jnp.dot(patch, w_ref[...], preferred_element_type=jnp.float32)
    acc = acc + b_ref[...].astype(jnp.float32)        # (1, 4*Cout) broadcast

    o_ref[0] = acc.reshape(tHi, W, Co4).astype(o_ref.dtype)


def _parity_fused_weights(w_oihw):
    """Fold the nearest-2x upsample into the conv weights.

    Returns (9*Cin, 4*Cout); row order is (tap_p, tap_q, cin), column order is
    (parity_a, parity_b, cout).  Output pixel (2i+a, 2j+b) equals the 3x3
    original-resolution conv of the padded input at (i, j) with these weights.
    """
    Cout, Cin = w_oihw.shape[0], w_oihw.shape[1]
    w_hwio = jnp.transpose(w_oihw, (2, 3, 1, 0)).astype(jnp.float32)  # (3,3,Cin,Cout)
    # R[a, p, dh] = 1  iff  (a + dh + 1) // 2 == p   (nearest-2x index algebra).
    R = jnp.array([[[1., 0., 0.], [0., 1., 1.], [0., 0., 0.]],
                   [[0., 0., 0.], [1., 1., 0.], [0., 0., 1.]]], jnp.float32)
    w_big = jnp.einsum("apd,bqe,decf->pqcabf", R, R, w_hwio)
    return w_big.reshape(9 * Cin, 4 * Cout)


@functools.partial(jax.jit, static_argnames=("with_conv", "row_block"))
def upsample_forward(x_nchw, w_oihw, bias, with_conv=True, row_block=8):
    """Matches Upsample.forward: nearest 2x upsample, then 3x3 conv (pad=1).

    x_nchw: (B, Cin, H, W) -> (B, Cout, 2H, 2W).  w_oihw: (Cout, Cin, 3, 3).
    """
    B, Cin, H, W = x_nchw.shape
    if not with_conv:
        return jnp.repeat(jnp.repeat(x_nchw, 2, axis=2), 2, axis=3)

    Cout = w_oihw.shape[0]
    dtype = x_nchw.dtype
    itemsize = x_nchw.dtype.itemsize

    # Row-block size at ORIGINAL resolution (each block -> 2*tHi output rows).
    tHi = max(1, min(row_block, H))
    while H % tHi:
        tHi -= 1
    n_blk = H // tHi

    # NCHW -> NHWC on the small pre-upsample tensor, pad by 1 (original res).
    x_pad = jnp.pad(jnp.transpose(x_nchw, (0, 2, 3, 1)),
                    ((0, 0), (1, 1), (1, 1), (0, 0)))        # (B, H+2, W+2, Cin)

    w_big = _parity_fused_weights(w_oihw).astype(dtype)      # (9*Cin, 4*Cout)
    b_big = jnp.tile(bias, 4).reshape(1, 4 * Cout).astype(dtype)

    # Body block + two 1-row halo blocks on the SAME padded input array.
    body_spec = pl.BlockSpec((1, tHi, W + 2, Cin), lambda b, g: (b, g, 0, 0))
    halo0_spec = pl.BlockSpec((1, 1, W + 2, Cin),
                              lambda b, g: (b, (g + 1) * tHi, 0, 0))
    halo1_spec = pl.BlockSpec((1, 1, W + 2, Cin),
                              lambda b, g: (b, (g + 1) * tHi + 1, 0, 0))
    w_spec = pl.BlockSpec((9 * Cin, 4 * Cout), lambda b, g: (0, 0))
    b_spec = pl.BlockSpec((1, 4 * Cout), lambda b, g: (0, 0))
    out_spec = pl.BlockSpec((1, tHi, W, 4 * Cout), lambda b, g: (b, g, 0, 0))

    grid_spec = pltpu.PrefetchScalarGridSpec(
        num_scalar_prefetch=0,
        grid=(B, n_blk),
        in_specs=[body_spec, halo0_spec, halo1_spec, w_spec, b_spec],
        out_specs=out_spec,
    )

    cost = pl.CostEstimate(
        flops=2 * B * H * W * (9 * Cin) * (4 * Cout),
        transcendentals=0,
        bytes_accessed=itemsize * (B * (H + 2) * (W + 2) * Cin
                                   + 9 * Cin * 4 * Cout + 4 * Cout
                                   + B * H * W * 4 * Cout),
    )

    y = pl.pallas_call(
        _upsample_conv_kernel,
        out_shape=jax.ShapeDtypeStruct((B, H, W, 4 * Cout), dtype),
        grid_spec=grid_spec,
        compiler_params=pltpu.CompilerParams(
            dimension_semantics=("parallel", "parallel")),
        cost_estimate=cost,
    )(x_pad, x_pad, x_pad, w_big, b_big)

    # De-interleave the 4 parities and convert NHWC->NCHW in ONE transpose pass.
    y6 = y.reshape(B, H, W, 2, 2, Cout)                 # (b, i, j, a, b_, co)
    out = jnp.transpose(y6, (0, 5, 1, 3, 2, 4))         # (b, co, i, a, j, b_)
    return out.reshape(B, Cout, 2 * H, 2 * W)


if __name__ == "__main__":
    B, Cin, H, W = 2, 4, 16, 16
    Cout = 8

    key = jax.random.PRNGKey(0)
    kx, kw, kb = jax.random.split(key, 3)
    x = jax.random.normal(kx, (B, Cin, H, W), dtype=jnp.float32)
    # Deterministic synthetic parameters (same shapes as nn.Conv2d(Cin, Cout, 3)).
    w = jax.random.normal(kw, (Cout, Cin, 3, 3), dtype=jnp.float32) * 0.1
    b = jax.random.normal(kb, (Cout,), dtype=jnp.float32) * 0.1

    out = upsample_forward(x, w, b, with_conv=True)
    out = jax.block_until_ready(out)
    assert out.shape == (B, Cout, 2 * H, 2 * W), out.shape

    # Reference: nearest-2x upsample in XLA, then lax.conv with SAME padding.
    x_up = jnp.repeat(jnp.repeat(x, 2, axis=2), 2, axis=3)  # NCHW nearest 2x
    ref = jax.lax.conv_general_dilated(
        x_up, w, window_strides=(1, 1), padding="SAME",
        dimension_numbers=("NCHW", "OIHW", "NCHW"),
    ) + b[None, :, None, None]
    assert jnp.allclose(out, ref, atol=1e-4, rtol=1e-4), \
        float(jnp.max(jnp.abs(out - ref)))

    print("KERNEL_OK")
</pallas_src>

<mosaic_0001>
module attributes {stable_mosaic.version = 11 : i64} {
  func.func @_upsample_conv_kernel(%arg0: i32, %arg1: i32, %arg2: memref<1x8x18x4xf32, #tpu.memory_space<vmem>>, %arg3: memref<1x1x18x4xf32, #tpu.memory_space<vmem>>, %arg4: memref<1x1x18x4xf32, #tpu.memory_space<vmem>>, %arg5: memref<36x32xf32, #tpu.memory_space<vmem>>, %arg6: memref<1x32xf32, #tpu.memory_space<vmem>>, %arg7: memref<1x8x16x32xf32, #tpu.memory_space<vmem>>) attributes {dimension_semantics = [#tpu.dimension_semantics<parallel>, #tpu.dimension_semantics<parallel>], iteration_bounds = array<i64: 2, 2>, scalar_prefetch = 0 : i64, scratch_operands = 0 : i64, tpu.core_type = #tpu.core_type<tc>, window_params = [{transform_indices = @transform_0, window_bounds = array<i64: 1, 8, 18, 4>}, {transform_indices = @transform_1, window_bounds = array<i64: 1, 1, 18, 4>}, {transform_indices = @transform_2, window_bounds = array<i64: 1, 1, 18, 4>}, {pipeline_mode = #tpu.pipeline_mode<synchronous>, transform_indices = @transform_3, window_bounds = array<i64: 36, 32>}, {pipeline_mode = #tpu.pipeline_mode<synchronous>, transform_indices = @transform_4, window_bounds = array<i64: 1, 32>}, {transform_indices = @transform_5, window_bounds = array<i64: 1, 8, 16, 32>}]} {
    %c0 = arith.constant 0 : index
    %c0_0 = arith.constant 0 : index
    %c0_1 = arith.constant 0 : index
    %c0_2 = arith.constant 0 : index
    %0 = vector.load %arg2[%c0, %c0_0, %c0_1, %c0_2] : memref<1x8x18x4xf32, #tpu.memory_space<vmem>>, vector<1x8x18x4xf32>
    %1 = vector.shape_cast %0 : vector<1x8x18x4xf32> to vector<8x18x4xf32>
    %c0_3 = arith.constant 0 : index
    %c0_4 = arith.constant 0 : index
    %c0_5 = arith.constant 0 : index
    %c0_6 = arith.constant 0 : index
    %2 = vector.load %arg3[%c0_3, %c0_4, %c0_5, %c0_6] : memref<1x1x18x4xf32, #tpu.memory_space<vmem>>, vector<1x1x18x4xf32>
    %3 = vector.shape_cast %2 : vector<1x1x18x4xf32> to vector<1x18x4xf32>
    %c0_7 = arith.constant 0 : index
    %c0_8 = arith.constant 0 : index
    %c0_9 = arith.constant 0 : index
    %c0_10 = arith.constant 0 : index
    %4 = vector.load %arg4[%c0_7, %c0_8, %c0_9, %c0_10] : memref<1x1x18x4xf32, #tpu.memory_space<vmem>>, vector<1x1x18x4xf32>
    %5 = vector.shape_cast %4 : vector<1x1x18x4xf32> to vector<1x18x4xf32>
    %6 = tpu.concatenate %1, %3, %5 in 0 : vector<8x18x4xf32>, vector<1x18x4xf32>, vector<1x18x4xf32> -> vector<10x18x4xf32>
    %7 = vector.extract_strided_slice %6 {offsets = [0, 0, 0], sizes = [8, 16, 4], strides = [1, 1, 1]} : vector<10x18x4xf32> to vector<8x16x4xf32>
    %8 = vector.extract_strided_slice %6 {offsets = [0, 1, 0], sizes = [8, 16, 4], strides = [1, 1, 1]} : vector<10x18x4xf32> to vector<8x16x4xf32>
    %9 = vector.extract_strided_slice %6 {offsets = [0, 2, 0], sizes = [8, 16, 4], strides = [1, 1, 1]} : vector<10x18x4xf32> to vector<8x16x4xf32>
    %10 = vector.extract_strided_slice %6 {offsets = [1, 0, 0], sizes = [8, 16, 4], strides = [1, 1, 1]} : vector<10x18x4xf32> to vector<8x16x4xf32>
    %11 = vector.extract_strided_slice %6 {offsets = [1, 1, 0], sizes = [8, 16, 4], strides = [1, 1, 1]} : vector<10x18x4xf32> to vector<8x16x4xf32>
    %12 = vector.extract_strided_slice %6 {offsets = [1, 2, 0], sizes = [8, 16, 4], strides = [1, 1, 1]} : vector<10x18x4xf32> to vector<8x16x4xf32>
    %13 = vector.extract_strided_slice %6 {offsets = [2, 0, 0], sizes = [8, 16, 4], strides = [1, 1, 1]} : vector<10x18x4xf32> to vector<8x16x4xf32>
    %14 = vector.extract_strided_slice %6 {offsets = [2, 1, 0], sizes = [8, 16, 4], strides = [1, 1, 1]} : vector<10x18x4xf32> to vector<8x16x4xf32>
    %15 = vector.extract_strided_slice %6 {offsets = [2, 2, 0], sizes = [8, 16, 4], strides = [1, 1, 1]} : vector<10x18x4xf32> to vector<8x16x4xf32>
    %16 = tpu.concatenate %7, %8, %9, %10, %11, %12, %13, %14, %15 in 2 : vector<8x16x4xf32>, vector<8x16x4xf32>, vector<8x16x4xf32>, vector<8x16x4xf32>, vector<8x16x4xf32>, vector<8x16x4xf32>, vector<8x16x4xf32>, vector<8x16x4xf32>, vector<8x16x4xf32> -> vector<8x16x36xf32>
    %17 = vector.shape_cast %16 : vector<8x16x36xf32> to vector<128x36xf32>
    %c0_11 = arith.constant 0 : index
    %c0_12 = arith.constant 0 : index
    %18 = vector.load %arg5[%c0_11, %c0_12] : memref<36x32xf32, #tpu.memory_space<vmem>>, vector<36x32xf32>
    %cst = arith.constant dense<0.000000e+00> : vector<128x32xf32>
    %19 = tpu.matmul %17, %18, %cst {dimension_numbers = #tpu.dot_dimension_numbers<[1], [0], [0], [1], [0, 0, 1, 1], [], []>} : vector<128x36xf32>, vector<36x32xf32>, vector<128x32xf32> -> vector<128x32xf32>
    %c0_13 = arith.constant 0 : index
    %c0_14 = arith.constant 0 : index
    %20 = vector.load %arg6[%c0_13, %c0_14] : memref<1x32xf32, #tpu.memory_space<vmem>>, vector<1x32xf32>
    %21 = vector.broadcast %20 : vector<1x32xf32> to vector<128x32xf32>
    %22 = arith.addf %19, %21 : vector<128x32xf32>
    %23 = vector.shape_cast %22 : vector<128x32xf32> to vector<8x16x32xf32>
    %c0_15 = arith.constant 0 : index
    %c0_16 = arith.constant 0 : index
    %c0_17 = arith.constant 0 : index
    %c0_18 = arith.constant 0 : index
    %24 = vector.load %arg7[%c0_15, %c0_16, %c0_17, %c0_18] : memref<1x8x16x32xf32, #tpu.memory_space<vmem>>, vector<1x8x16x32xf32>
    %25 = vector.shape_cast %24 : vector<1x8x16x32xf32> to vector<8x16x32xf32>
    %26 = vector.shape_cast %23 : vector<8x16x32xf32> to vector<1x8x16x32xf32>
    tpu.vector_store %arg7[%c0_15, %c0_16, %c0_17, %c0_18], %26 {strides = array<i32>} : memref<1x8x16x32xf32, #tpu.memory_space<vmem>>, vector<1x8x16x32xf32>,
    return
  }
  func.func @transform_0(%arg0: i32, %arg1: i32) -> (i32, i32, i32, i32) {
    %c0_i32 = arith.constant 0 : i32
    %c0_i32_0 = arith.constant 0 : i32
    %c0_i32_1 = arith.constant 0 : i32
    return %arg0, %arg1, %c0_i32, %c0_i32_0 : i32, i32, i32, i32
  }
  func.func @transform_1(%arg0: i32, %arg1: i32) -> (i32, i32, i32, i32) {
    %c1_i32 = arith.constant 1 : i32
    %0 = arith.addi %arg1, %c1_i32 : i32
    %c8_i32 = arith.constant 8 : i32
    %1 = arith.muli %0, %c8_i32 : i32
    %c0_i32 = arith.constant 0 : i32
    %c0_i32_0 = arith.constant 0 : i32
    %c0_i32_1 = arith.constant 0 : i32
    return %arg0, %1, %c0_i32, %c0_i32_0 : i32, i32, i32, i32
  }
  func.func @transform_2(%arg0: i32, %arg1: i32) -> (i32, i32, i32, i32) {
    %c1_i32 = arith.constant 1 : i32
    %0 = arith.addi %arg1, %c1_i32 : i32
    %c8_i32 = arith.constant 8 : i32
    %1 = arith.muli %0, %c8_i32 : i32
    %c1_i32_0 = arith.constant 1 : i32
    %2 = arith.addi %1, %c1_i32_0 : i32
    %c0_i32 = arith.constant 0 : i32
    %c0_i32_1 = arith.constant 0 : i32
    %c0_i32_2 = arith.constant 0 : i32
    return %arg0, %2, %c0_i32, %c0_i32_1 : i32, i32, i32, i32
  }
  func.func @transform_3(%arg0: i32, %arg1: i32) -> (i32, i32) {
    %c0_i32 = arith.constant 0 : i32
    %c0_i32_0 = arith.constant 0 : i32
    %c0_i32_1 = arith.constant 0 : i32
    return %c0_i32, %c0_i32_0 : i32, i32
  }
  func.func @transform_4(%arg0: i32, %arg1: i32) -> (i32, i32) {
    %c0_i32 = arith.constant 0 : i32
    %c0_i32_0 = arith.constant 0 : i32
    %c0_i32_1 = arith.constant 0 : i32
    return %c0_i32, %c0_i32_0 : i32, i32
  }
  func.func @transform_5(%arg0: i32, %arg1: i32) -> (i32, i32, i32, i32) {
    %c0_i32 = arith.constant 0 : i32
    %c0_i32_0 = arith.constant 0 : i32
    %c0_i32_1 = arith.constant 0 : i32
    return %arg0, %arg1, %c0_i32, %c0_i32_0 : i32, i32, i32, i32
  }
}

</mosaic_0001>

<bundles_post_ra>
// kernel: tile.8
= control target key start
LH: loop header
LB: loop body
LE: loop exit
PB: predicated region body
PF: predicated region fallthrough
CT: control target
= control target key end

     0   :  { %s22_s0 = inlined_call_operand.vmem [shape: f32[8], index: 0, kind: input, shape index: {}]   ;;  %s23_s1 = inlined_call_operand.vmem [shape: f32[4,8], index: 1, kind: output, shape index: {}]  }
   0x1   :  { %v4_v0 = vld [vmem:[%s22_s0] ss:$0 sm:$0xff] }
   0x2   :  { %5 = vst [vmem:[%s23_s1] sm:$0xf] %v4_v0 }

// kernel: tile.9
= control target key start
LH: loop header
LB: loop body
LE: loop exit
PB: predicated region body
PF: predicated region fallthrough
CT: control target
= control target key end

     0   :  { %vm7_vm0 = vcmask 64512   ;;  %s37_s8 = smov 8   ;;  %s38_s9 = smov 16   ;;  %vm13_vm1 = vcmask 261312   ;;  %vm19_vm2 = vcmask 195712   ;;  %vm25_vm3 = vcmask 130112   ;;  %s55_s0 = inlined_call_operand.vmem [shape: f32[4,8], index: 0, kind: input, shape index: {}]   ;;  %s56_s1 = inlined_call_operand.vmem [shape: f32[1,32], index: 1, kind: output, shape index: {}]  }
   0x1   :  { %v4_v0 = vld [vmem:[%s55_s0] sm:$0xf]  ;;  %s36_s0 = smov 24  }
   0x2   :  { %5 = vst [vmem:[#allocation1] sm:$0xf] %v4_v0 }
   0x9   :  { %v10_v1 = vld [vmem:[#allocation1 + $0x3] sm:$0x1]   ;;  %v22_v2 = vld [vmem:[#allocation1 + $0x1] sm:$0x1]   ;;  %v6_v3 = vld [vmem:[#allocation1] sm:$0x1]  }
   0xa   :  { %11 = vrot.lane.b32.xlu0 %v10_v1, %s36_s0  ;;  %23 = vrot.lane.b32.xlu1 %v22_v2, %s37_s8  ;;  %v16_v4 = vld [vmem:[#allocation1 + $0x2] sm:$0x1]   ;;  %8 = vst.msk [vmem:[#allocation0] sm:$0x1] %vm7_vm0, %v6_v3  }
   0xe   :  { %17 = vrot.lane.b32.xlu0 %v16_v4, %s38_s9 }
  0x7c   :  { %v12_v5 = vpop.permute.xlu0 %11   ;;  %v24_v6 = vpop.permute.xlu1 %23  }
  0x7d   :  { %14 = vst.msk [vmem:[#allocation0] sm:$0x1] %vm13_vm1, %v12_v5  }
  0x80   :  { %v18_v7 = vpop.permute.xlu0 %17  }
  0x81   :  { %20 = vst.msk [vmem:[#allocation0] sm:$0x1] %vm19_vm2, %v18_v7  }
  0x82   :  { %26 = vst.msk [vmem:[#allocation0] sm:$0x1] %vm25_vm3, %v24_v6  }
  0x89   :  { %v30_v8 = vld [vmem:[#allocation0] sm:$0x1] }
  0x8a   :  { %32 = vst [vmem:[%s56_s1] sm:$0x1] %v30_v8 }

// kernel: upsample_forward.1
= control target key start
LH: loop header
LB: loop body
LE: loop exit
PB: predicated region body
PF: predicated region fallthrough
CT: control target
= control target key end

     0   :  { %s1696_s18 = smov 0   ;;  %s1698_s19 = smov 0   ;;  %s2475_s0 = inlined_call_operand.vmem [shape: f32[2,18,18,4], index: 0, kind: input, shape index: {}, may-alias: {0,1,2}]   ;;  %s2476_s1 = inlined_call_operand.vmem [shape: f32[2,18,18,4], index: 1, kind: input, shape index: {}, may-alias: {0,1,2}]   ;;  %s2477_s2 = inlined_call_operand.vmem [shape: f32[2,18,18,4], index: 2, kind: input, shape index: {}, may-alias: {0,1,2}]   ;;  %s2478_s3 = inlined_call_operand.vmem [shape: f32[36,32], index: 3, kind: input, shape index: {}]   ;;  %s2479_s4 = inlined_call_operand.vmem [shape: f32[1,32], index: 4, kind: input, shape index: {}]   ;;  %s2480_s5 = inlined_call_operand.vmem [shape: f32[2,16,16,32], index: 5, kind: output, shape index: {}]  }
   0x1   :  { %s1700_s20 = smov 0   ;;  %s1702_s21 = smov 0  }
   0x2   :  { %s1704_s22 = smov 0  }
   0x3 LB: > { %s24_s23 = sadd.s32 1, %s1648_s20  ;;  %s27_s24 = sadd.s32 1, %s1652_s21  ;;  %s1656_s22 = sphi %s1704_s22, %s15_s22   ;;  %s1652_s21 = sphi %s1702_s21, %s2512_s21   ;;  %s1648_s20 = sphi %s1700_s20, %s2511_s20   ;;  %s1644_s19 = sphi %s1698_s19, %s2510_s19   ;;  %s1640_s18 = sphi %s1696_s18, %s2509_s18  }
   0x4   : > { %p25_p0 = scmp.ge.s32.totalorder %s24_s23, 2  ;;  %p1454_p1 = scmp.ge.s32.totalorder %s1656_s22, 1 }
   0x5   : > { %p271_p2 = scmp.lt.s32.totalorder %s1656_s22, 5 }
   0x6   : > { %s2514_s23 = smov (%p25_p0, %s24_s23), 0  ;;  %s2516_s24 = smov (!%p25_p0, %s27_s24), %s1652_s21 }
   0x7   : > { %p272_p3 = pnand %p1454_p1, %p271_p2  ;;  %p29_p4 = scmp.ge.s32.totalorder %s2516_s24, 2 }
   0x9   : > { %s2518_s24 = smov (%p29_p4, %s2516_s24), 0  ;;  %275 = sbr.rel (%p272_p3) target bundleno = 615 (0x267), region = 40 }
  0x10   : > { %s1726_s25 = sshll.u32 %s1640_s18, 3  ;;  %p343_p5 = scmp.lt.s32.totalorder %s1644_s19, 1  ;;  %vm451_vm0 = vcmask 1046528   ;;  %vm540_vm1 = vcmask 1045504   ;;  %vm1140_vm2 = vcmask 1043456   ;;  %vm943_vm3 = vcmask 31744  }
  0x11   : > { %p345_p6 = scmp.lt.s32.totalorder %s1726_s25, 17  ;;  %s1658_s9 = smov 4   ;;  %vm960_vm4 = vcmask 64512   ;;  %vm977_vm5 = vcmask 97280   ;;  %vm994_vm6 = vcmask 130048   ;;  %vm1011_vm7 = vcmask 162816  }
  0x12   : > { %s2520_s19 = smov (!%p343_p5, %s1644_s19), 1  ;;  %s1659_s10 = smov 8   ;;  %vm1028_vm8 = vcmask 195584   ;;  %vm1045_vm9 = vcmask 228352   ;;  %vm1062_vm10 = vcmask 261120   ;;  %vm1091_vm11 = vcmask 293888  }
  0x13   : > { %s346_s26 = scalar_select %p345_p6, %s1726_s25, 17 }
  0x14   : > { %s1733_s27 = smul.u32 54, %s2520_s19  ;;  %s1660_s11 = smov 12  }
  0x15   : > { %s1566_s28 = smul.u32 3, %s346_s26  ;;  %s1661_s12 = smov 16  }
  0x16   : > { %s1662_s13 = smov 20   ;;  %s1663_s14 = smov 24  }
  0x17   : > { %s349_s29 = sadd.s32 %s1733_s27, %s1566_s28  ;;  %s1664_s15 = smov 28  }
  0x18   : > { %s1456_s30 = sshll.u32 %s349_s29, 3  ;;  %s1665_s7 = smov 32  }
  0x19   : > { %s1739_s8 = scalar_lea.vmem %s2475_s0, %s1456_s30  ;;  %p389_p9 = scmp.lt.s32.totalorder %s1726_s25, 15 }
  0x1a   : > { %v1742_v0 = vld [vmem:[%s1739_s8 + $0x8] sm:$0xff]  ;;  %v399_v1 = vld [vmem:[%s1739_s8 + $0x10] sm:$0x3]  ;;  %v1746_v2 = vld [vmem:[%s1739_s8] sm:$0xff] }
  0x1b   : > { %v453_v3 = vrot.slane %v1742_v0, 1  ;;  %v455_v4 = vrot.slane %v399_v1, 1  ;;  %v452_v5 = vrot.slane %v1746_v2, 1  ;;  %v1751_v6 = vld [vmem:[%s1739_s8 + $0x68] sm:$0xff]  ;;  %v411_v7 = vld [vmem:[%s1739_s8 + $0x70] sm:$0x3] }
  0x1c   : > { %v473_v8 = vrot.slane %v1751_v6, 1  ;;  %v475_v9 = vrot.slane %v411_v7, 1  ;;  %v1756_v10 = vld [vmem:[%s1739_s8 + $0x60] sm:$0xff]  ;;  %v562_v14 = vrot.slane %v1751_v6, 2  ;;  %v541_v15 = vrot.slane %v1746_v2, 2  ;;  %v1792_v26 = vld [vmem:[%s1739_s8 + $0x78] sm:$0xff] }
  0x1d   : > { %v456_v11 = vsel %vm451_vm0, %v453_v3, %v455_v4  ;;  %v454_v12 = vsel %vm451_vm0, %v452_v5, %v453_v3  ;;  %v472_v13 = vrot.slane %v1756_v10, 1  ;;  %v561_v18 = vrot.slane %v1756_v10, 2  ;;  %v1795_v27 = vld [vmem:[%s1739_s8 + $0x18] sm:$0xff]  ;;  %v1798_v28 = vld [vmem:[%s1739_s8 + $0x80] sm:$0xff]  ;;  %v414_v36 = vld [vmem:[%s1739_s8 + $0x88] sm:$0x3] }
  0x1e   : > { %494 = vrot.lane.b32.xlu1 %v456_v11, %s1658_s9  ;;  %492 = vrot.lane.b32.xlu0 %v454_v12, %s1658_s9  ;;  %v1766_v16 = vsel %vm451_vm0, %v473_v8, %v475_v9  ;;  %v542_v19 = vrot.slane %v1742_v0, 2  ;;  %v564_v22 = vrot.slane %v411_v7, 2  ;;  %v544_v23 = vrot.slane %v399_v1, 2  ;;  %v1801_v29 = vld [vmem:[%s1739_s8 + $0x20] sm:$0xff]  ;;  %v402_v37 = vld [vmem:[%s1739_s8 + $0x28] sm:$0x3] }
  0x1f   : > { %v1769_v17 = vsel %vm451_vm0, %v472_v13, %v473_v8  ;;  %v1778_v20 = vsel %vm540_vm1, %v561_v18, %v562_v14  ;;  %v477_v30 = vrot.slane %v1792_v26, 1  ;;  %v478_v31 = vrot.slane %v1798_v28, 1  ;;  %v1859_v52 = vld [vmem:[%s1739_s8 + $0x90] sm:$0xff]  ;;  %v1872_v54 = vld [vmem:[%s1739_s8 + $0x98] sm:$0xff]  ;;  %v417_v62 = vld [vmem:[%s1739_s8 + $0xa0] sm:$0x3] }
  0x20   : > { %v543_v21 = vsel %vm540_vm1, %v541_v15, %v542_v19  ;;  %v1785_v24 = vsel %vm540_vm1, %v562_v14, %v564_v22  ;;  %v545_v25 = vsel %vm540_vm1, %v542_v19, %v544_v23  ;;  %v457_v32 = vrot.slane %v1795_v27, 1  ;;  %v1862_v53 = vld [vmem:[%s1739_s8 + $0x30] sm:$0xff]  ;;  %v1875_v55 = vld [vmem:[%s1739_s8 + $0x38] sm:$0xff]  ;;  %v405_v63 = vld [vmem:[%s1739_s8 + $0x40] sm:$0x3] }
  0x21   : > { %v458_v33 = vrot.slane %v1801_v29, 1  ;;  %v1816_v34 = vsel %vm451_vm0, %v477_v30, %v478_v31  ;;  %v480_v38 = vrot.slane %v414_v36, 1  ;;  %v460_v39 = vrot.slane %v402_v37, 1  ;;  %2494 = vst [vmem:[#allocation6_spill] sm:$0xff] %v1875_v55  ;;  %v1079_v8 = vld [vmem:[%s2478_s3] sm:$0xff]  ;;  %v1080_v9 = vld [vmem:[%s2478_s3 + $0x8] sm:$0xff] }
  0x22   : > { %510 = vrot.lane.b32.xlu1 %v1766_v16, %s1658_s9  ;;  %508 = vrot.lane.b32.xlu0 %v1769_v17, %s1658_s9  ;;  %2490 = vst [vmem:[#allocation2_spill] sm:$0xff] %v1816_v34  ;;  %v566_v40 = vrot.slane %v1792_v26, 2  ;;  %v567_v41 = vrot.slane %v1798_v28, 2  ;;  %v546_v44 = vrot.slane %v1795_v27, 2  ;;  %v547_v45 = vrot.slane %v1801_v29, 2  ;;  %v1081_v15 = vld [vmem:[%s2478_s3 + $0x10] sm:$0xff] }
  0x23   : > { %v459_v35 = vsel %vm451_vm0, %v457_v32, %v458_v33  ;;  %v1830_v42 = vsel %vm451_vm0, %v478_v31, %v480_v38  ;;  %v461_v43 = vsel %vm451_vm0, %v458_v33, %v460_v39  ;;  %v569_v48 = vrot.slane %v414_v36, 2  ;;  %v1082_v18 = vld [vmem:[%s2478_s3 + $0x18] sm:$0xff]  ;;  %v1083_v23 = vld [vmem:[%s2478_s3 + $0x20] sm:$0xf]  ;;  %v1945_v33 = vld [vmem:[%s1739_s8 + $0xa8] sm:$0xff] }
  0x24   : > { %2491 = vst [vmem:[#allocation3_spill] sm:$0xff] %v1830_v42  ;;  %v1839_v46 = vsel %vm540_vm1, %v566_v40, %v567_v41  ;;  %v548_v47 = vsel %vm540_vm1, %v546_v44, %v547_v45  ;;  %v549_v49 = vrot.slane %v402_v37, 2  ;;  %v482_v56 = vrot.slane %v1859_v52, 1  ;;  %2495 = vst [vmem:[#allocation7_spill] sm:$0xff] %v1945_v33  ;;  %v1972_v44 = vld [vmem:[%s1739_s8 + $0x50] sm:$0xff] }
  0x25   : > { %2492 = vst [vmem:[#allocation4_spill] sm:$0xff] %v1839_v46  ;;  %v1852_v50 = vsel %vm540_vm1, %v567_v41, %v569_v48  ;;  %v483_v57 = vrot.slane %v1872_v54, 1  ;;  %v462_v58 = vrot.slane %v1862_v53, 1  ;;  %v463_v59 = vrot.slane %v1875_v55, 1  ;;  %2498 = vst [vmem:[#allocation10_spill] sm:$0xff] %v1972_v44 }
  0x26   : > { %597 = vrot.lane.b32.xlu1 %v1778_v20, %s1659_s10  ;;  %581 = vrot.lane.b32.xlu0 %v543_v21, %s1659_s10  ;;  %2493 = vst [vmem:[#allocation5_spill] sm:$0xff] %v1852_v50  ;;  %v550_v51 = vsel %vm540_vm1, %v547_v45, %v549_v49  ;;  %v485_v1 = vrot.slane %v417_v62, 1  ;;  %v465_v3 = vrot.slane %v405_v63, 1  ;;  %v571_v4 = vrot.slane %v1859_v52, 2 }
  0x27   : > { %v484_v60 = vsel %vm451_vm0, %v482_v56, %v483_v57  ;;  %v464_v61 = vsel %vm451_vm0, %v462_v58, %v463_v59  ;;  %v572_v5 = vrot.slane %v1872_v54, 2  ;;  %v551_v7 = vrot.slane %v1862_v53, 2 }
  0x28   : > { %v486_v11 = vsel %vm451_vm0, %v483_v57, %v485_v1  ;;  %v466_v12 = vsel %vm451_vm0, %v463_v59, %v465_v3  ;;  %v552_v13 = vrot.slane %v1875_v55, 2  ;;  %v1552_v14 = vpack.c.bf16 %v1080_v9, %v1079_v8 }
  0x29   : > { %v573_v19 = vsel %vm540_vm1, %v571_v4, %v572_v5  ;;  %v1556_v22 = vpack.c.bf16 %v1082_v18, %v1081_v15  ;;  %v554_v30 = vrot.slane %v405_v63, 2  ;;  %v487_v45 = vrot.slane %v1945_v33, 1 }
  0x2a   : > { %599 = vrot.lane.b32.xlu1 %v1785_v24, %s1659_s10  ;;  %583 = vrot.lane.b32.xlu0 %v545_v25, %s1659_s10  ;;  %v553_v21 = vsel %vm540_vm1, %v551_v7, %v552_v13  ;;  %v574_v25 = vrot.slane %v417_v62, 2  ;;  %v468_v49 = vrot.slane %v1972_v44, 1  ;;  %v408_v62 = vld [vmem:[%s1739_s8 + $0x58] sm:$0x3] }
  0x2b   : > { %1553 = vmatprep.subr.bf16.mxu0 %v1552_v14  ;;  %1560 = vmatprep.subr.bf16.mxu1 %v1552_v14  ;;  %v555_v32 = vsel %vm540_vm1, %v552_v13, %v554_v30  ;;  %v470_v4 = vrot.slane %v408_v62, 1 }
  0x2c   : > { %1555 = vmatpush3.bf16.msra.mxu0 %v1552_v14  ;;  %1563 = vmatpush3.bf16.msra.mxu1 %v1552_v14  ;;  %v575_v31 = vsel %vm540_vm1, %v572_v5, %v574_v25  ;;  %v557_v14 = vrot.slane %v1972_v44, 2 }
  0x2d   : > { %1557 = vmatprep.subr.bf16.mxu0 %v1556_v22  ;;  %1561 = vmatprep.subr.bf16.mxu1 %v1556_v22  ;;  %v471_v9 = vsel %vm451_vm0, %v468_v49, %v470_v4 }
  0x2e   : > { %647 = vrot.lane.b32.xlu1 %v1792_v26, %s1660_s11  ;;  %631 = vrot.lane.b32.xlu0 %v1795_v27, %s1660_s11 }
  0x30   : > { %1559 = vmatpush3.bf16.msra.mxu0 %v1556_v22  ;;  %1564 = vmatpush3.bf16.msra.mxu1 %v1556_v22 }
  0x31   : > { %1526 = vmatprep.subr.msk.mxu0 %vm1140_vm2, %v1083_v23  ;;  %1562 = vmatprep.subr.msk.mxu1 %vm1140_vm2, %v1083_v23 }
  0x32   : > { %649 = vrot.lane.b32.xlu1 %v1798_v28, %s1660_s11  ;;  %633 = vrot.lane.b32.xlu0 %v1801_v29, %s1660_s11 }
  0x34   : > { %1527 = vmatpush3.msk.msra.mxu0 %vm1140_vm2, %v1083_v23  ;;  %1565 = vmatpush3.msk.msra.mxu1 %vm1140_vm2, %v1083_v23 }
  0x36   : > { %701 = vrot.lane.b32.xlu1 %v1816_v34, %s1661_s12  ;;  %685 = vrot.lane.b32.xlu0 %v459_v35, %s1661_s12 }
  0x3a   : > { %512 = vrot.lane.b32.xlu1 %v1816_v34, %s1658_s9  ;;  %496 = vrot.lane.b32.xlu0 %v459_v35, %s1658_s9  ;;  %v1948_v35 = vld [vmem:[%s1739_s8 + $0x48] sm:$0xff] }
  0x3b   : > { %2496 = vst [vmem:[#allocation8_spill] sm:$0xff] %v1948_v35  ;;  %v467_v48 = vrot.slane %v1948_v35, 1  ;;  %v556_v13 = vrot.slane %v1948_v35, 2 }
  0x3d   : > { %v469_v58 = vsel %vm451_vm0, %v467_v48, %v468_v49 }
  0x3e   : > { %703 = vrot.lane.b32.xlu1 %v1830_v42, %s1661_s12  ;;  %687 = vrot.lane.b32.xlu0 %v461_v43, %s1661_s12 }
  0x42   : > { %754 = vrot.lane.b32.xlu1 %v1839_v46, %s1662_s13  ;;  %738 = vrot.lane.b32.xlu0 %v548_v47, %s1662_s13 }
  0x46   : > { %514 = vrot.lane.b32.xlu1 %v1830_v42, %s1658_s9  ;;  %498 = vrot.lane.b32.xlu0 %v461_v43, %s1658_s9  ;;  %v1969_v43 = vld [vmem:[%s1739_s8 + $0xb0] sm:$0xff] }
  0x47   : > { %2497 = vst [vmem:[#allocation9_spill] sm:$0xff] %v1969_v43 }
  0x4a   : > { %601 = vrot.lane.b32.xlu1 %v1839_v46, %s1659_s10  ;;  %585 = vrot.lane.b32.xlu0 %v548_v47, %s1659_s10  ;;  %v488_v47 = vrot.slane %v1969_v43, 1 }
  0x4c   : > { %v489_v57 = vsel %vm451_vm0, %v487_v45, %v488_v47 }
  0x4e   : > { %756 = vrot.lane.b32.xlu1 %v1852_v50, %s1662_s13  ;;  %740 = vrot.lane.b32.xlu0 %v550_v51, %s1662_s13 }
  0x52   : > { %804 = vrot.lane.b32.xlu1 %v1859_v52, %s1663_s14  ;;  %788 = vrot.lane.b32.xlu0 %v1862_v53, %s1663_s14 }
  0x56   : > { %603 = vrot.lane.b32.xlu1 %v1852_v50, %s1659_s10  ;;  %587 = vrot.lane.b32.xlu0 %v550_v51, %s1659_s10 }
  0x5a   : > { %651 = vrot.lane.b32.xlu1 %v1859_v52, %s1660_s11  ;;  %635 = vrot.lane.b32.xlu0 %v1862_v53, %s1660_s11 }
  0x5e   : > { %806 = vrot.lane.b32.xlu1 %v1872_v54, %s1663_s14  ;;  %790 = vrot.lane.b32.xlu0 %v1875_v55, %s1663_s14 }
  0x62   : > { %858 = vrot.lane.b32.xlu1 %v484_v60, %s1664_s15  ;;  %842 = vrot.lane.b32.xlu0 %v464_v61, %s1664_s15 }
  0x66   : > { %653 = vrot.lane.b32.xlu1 %v1872_v54, %s1660_s11  ;;  %637 = vrot.lane.b32.xlu0 %v1875_v55, %s1660_s11 }
  0x6a   : > { %705 = vrot.lane.b32.xlu1 %v484_v60, %s1661_s12  ;;  %689 = vrot.lane.b32.xlu0 %v464_v61, %s1661_s12 }
  0x6e   : > { %860 = vrot.lane.b32.xlu1 %v486_v11, %s1664_s15  ;;  %844 = vrot.lane.b32.xlu0 %v466_v12, %s1664_s15 }
  0x72   : > { %911 = vrot.lane.b32.xlu1 %v573_v19, %s1665_s7  ;;  %895 = vrot.lane.b32.xlu0 %v553_v21, %s1665_s7 }
  0x76   : > { %516 = vrot.lane.b32.xlu1 %v484_v60, %s1658_s9  ;;  %500 = vrot.lane.b32.xlu0 %v464_v61, %s1658_s9  ;;  %v420_v61 = vld [vmem:[%s1739_s8 + $0xb8] sm:$0x3]  ;;  %s2041_s8 = sadd.s32 8, %s1726_s25  ;;  %s2524_s25 = smov (!%p389_p9, %s1726_s25), 15 }
  0x77   : > { %v490_v3 = vrot.slane %v420_v61, 1  ;;  %p362_p7 = scmp.lt.s32.totalorder %s2041_s8, 17  ;;  %v579_v45 = vrot.slane %v420_v61, 2 }
  0x79   : > { %v491_v8 = vsel %vm451_vm0, %v488_v47, %v490_v3  ;;  %v559_v47 = vrot.slane %v408_v62, 2  ;;  %s363_s18 = scalar_select %p362_p7, %s2041_s8, 17 }
  0x7a   : > { %707 = vrot.lane.b32.xlu1 %v486_v11, %s1661_s12  ;;  %691 = vrot.lane.b32.xlu0 %v466_v12, %s1661_s12 }
  0x7b   : > { %s1568_s26 = smul.u32 3, %s363_s18 }
  0x7d   : > { %s366_s28 = sadd.s32 %s1568_s26, %s1733_s27 }
  0x7e   : > { %758 = vrot.lane.b32.xlu1 %v573_v19, %s1662_s13  ;;  %742 = vrot.lane.b32.xlu0 %v553_v21, %s1662_s13  ;;  %s1458_s29 = sshll.u32 %s366_s28, 3 }
  0x7f   : > { %s2077_s16 = scalar_lea.vmem %s2476_s1, %s1458_s29 }
  0x82   : > { %913 = vrot.lane.b32.xlu1 %v575_v31, %s1665_s7  ;;  %897 = vrot.lane.b32.xlu0 %v555_v32, %s1665_s7 }
  0x86   : > { %518 = vrot.lane.b32.xlu1 %v486_v11, %s1658_s9  ;;  %502 = vrot.lane.b32.xlu0 %v466_v12, %s1658_s9  ;;  %v576_v11 = vrot.slane %v1945_v33, 2  ;;  %v577_v12 = vrot.slane %v1969_v43, 2 }
  0x8a   : > { %605 = vrot.lane.b32.xlu1 %v573_v19, %s1659_s10  ;;  %589 = vrot.lane.b32.xlu0 %v553_v21, %s1659_s10  ;;  %v578_v19 = vsel %vm540_vm1, %v576_v11, %v577_v12  ;;  %v558_v21 = vsel %vm540_vm1, %v556_v13, %v557_v14 }
  0x8e   : > { %760 = vrot.lane.b32.xlu1 %v575_v31, %s1662_s13  ;;  %744 = vrot.lane.b32.xlu0 %v555_v32, %s1662_s13 }
  0x90   : > { %v1950_v36 = vpop.permute.xlu1 %494  ;;  %v1952_v37 = vpop.permute.xlu0 %492 }
  0x92   : > { %808 = vrot.lane.b32.xlu1 %v1945_v33, %s1663_s14  ;;  %792 = vrot.lane.b32.xlu0 %v1948_v35, %s1663_s14 }
  0x94   : > { %v1958_v38 = vpop.permute.xlu1 %510  ;;  %v1960_v39 = vpop.permute.xlu0 %508 }
  0x96   : > { %607 = vrot.lane.b32.xlu1 %v575_v31, %s1659_s10  ;;  %591 = vrot.lane.b32.xlu0 %v555_v32, %s1659_s10 }
  0x98   : > { %v1964_v40 = vpop.permute.xlu1 %597  ;;  %v1966_v41 = vpop.permute.xlu0 %581 }
  0x9a   : > { %655 = vrot.lane.b32.xlu1 %v1945_v33, %s1660_s11  ;;  %639 = vrot.lane.b32.xlu0 %v1948_v35, %s1660_s11 }
  0x9c   : > { %v1982_v51 = vpop.permute.xlu1 %599  ;;  %v1984_v56 = vpop.permute.xlu0 %583 }
  0x9e   : > { %810 = vrot.lane.b32.xlu1 %v1969_v43, %s1663_s14  ;;  %794 = vrot.lane.b32.xlu0 %v1972_v44, %s1663_s14 }
  0xa0   : > { %v1992_v59 = vpop.permute.xlu1 %647  ;;  %v1994_v60 = vpop.permute.xlu0 %631 }
  0xa2   : > { %862 = vrot.lane.b32.xlu1 %v489_v57, %s1664_s15  ;;  %846 = vrot.lane.b32.xlu0 %v469_v58, %s1664_s15 }
  0xa4   : > { %v2000_v63 = vpop.permute.xlu1 %649  ;;  %v2002_v1 = vpop.permute.xlu0 %633 }
  0xa6   : > { %657 = vrot.lane.b32.xlu1 %v1969_v43, %s1660_s11  ;;  %641 = vrot.lane.b32.xlu0 %v1972_v44, %s1660_s11  ;;  %v2099_v43 = vld [vmem:[%s2077_s16 + $0x8] sm:$0xff] }
  0xa7   : > { %v681_v46 = vrot.slane %v2099_v43, 1 }
  0xa8   : > { %v2008_v5 = vpop.permute.xlu1 %701  ;;  %v2010_v7 = vpop.permute.xlu0 %685 }
  0xaa   : > { %709 = vrot.lane.b32.xlu1 %v489_v57, %s1661_s12  ;;  %693 = vrot.lane.b32.xlu0 %v469_v58, %s1661_s12 }
  0xac   : > { %v2020_v15 = vpop.permute.xlu1 %512  ;;  %v2022_v18 = vpop.permute.xlu0 %496 }
  0xad   : > { %v954_v35 = vsel %vm943_vm3, %v1792_v26, %v2020_v15  ;;  %v946_v33 = vsel %vm943_vm3, %v1795_v27, %v2022_v18 }
  0xae   : > { %864 = vrot.lane.b32.xlu1 %v491_v8, %s1664_s15  ;;  %848 = vrot.lane.b32.xlu0 %v471_v9, %s1664_s15 }
  0xb0   : > { %v2028_v22 = vpop.permute.xlu1 %703  ;;  %v2030_v23 = vpop.permute.xlu0 %687 }
  0xb2   : > { %915 = vrot.lane.b32.xlu1 %v578_v19, %s1665_s7  ;;  %899 = vrot.lane.b32.xlu0 %v558_v21, %s1665_s7 }
  0xb4   : > { %v2034_v25 = vpop.permute.xlu1 %754  ;;  %v2036_v30 = vpop.permute.xlu0 %738 }
  0xb6   : > { %520 = vrot.lane.b32.xlu1 %v489_v57, %s1658_s9  ;;  %504 = vrot.lane.b32.xlu0 %v469_v58, %s1658_s9  ;;  %v580_v57 = vsel %vm540_vm1, %v577_v12, %v579_v45  ;;  %v560_v58 = vsel %vm540_vm1, %v557_v14, %v559_v47 }
  0xb8   : > { %v2043_v31 = vpop.permute.xlu1 %514  ;;  %v2045_v32 = vpop.permute.xlu0 %498 }
  0xba   : > { %711 = vrot.lane.b32.xlu1 %v491_v8, %s1661_s12  ;;  %695 = vrot.lane.b32.xlu0 %v471_v9, %s1661_s12 }
  0xbc   : > { %v602_v48 = vpop.permute.xlu1 %601  ;;  %v586_v49 = vpop.permute.xlu0 %585 }
  0xbe   : > { %762 = vrot.lane.b32.xlu1 %v578_v19, %s1662_s13  ;;  %746 = vrot.lane.b32.xlu0 %v558_v21, %s1662_s13 }
  0xc0   : > { %v2055_v3 = vpop.permute.xlu1 %756  ;;  %v2057_v4 = vpop.permute.xlu0 %740 }
  0xc2   : > { %917 = vrot.lane.b32.xlu1 %v580_v57, %s1665_s7  ;;  %901 = vrot.lane.b32.xlu0 %v560_v58, %s1665_s7 }
  0xc4   : > { %v2061_v61 = vpop.permute.xlu1 %804  ;;  %v2063_v62 = vpop.permute.xlu0 %788 }
  0xc6   : > { %522 = vrot.lane.b32.xlu1 %v491_v8, %s1658_s9  ;;  %506 = vrot.lane.b32.xlu0 %v471_v9, %s1658_s9  ;;  %v2082_v8 = vld [vmem:[%s2077_s16] sm:$0xff]  ;;  %s373_s9 = sadd.s32 1, %s2041_s8 }
  0xc7   : > { %v680_v50 = vrot.slane %v2082_v8, 1  ;;  %p2209_p8 = scmp.lt.s32.totalorder %s373_s9, 17 }
  0xc8   : > { %v2068_v11 = vpop.permute.xlu1 %603  ;;  %v2070_v12 = vpop.permute.xlu0 %587 }
  0xc9   : > { %s2522_s9 = smov (!%p2209_p8, %s373_s9), 17 }
  0xca   : > { %609 = vrot.lane.b32.xlu1 %v578_v19, %s1659_s10  ;;  %593 = vrot.lane.b32.xlu0 %v558_v21, %s1659_s10 }
  0xcc   : > { %v652_v13 = vpop.permute.xlu1 %651  ;;  %v636_v14 = vpop.permute.xlu0 %635 }
  0xce   : > { %764 = vrot.lane.b32.xlu1 %v580_v57, %s1662_s13  ;;  %748 = vrot.lane.b32.xlu0 %v560_v58, %s1662_s13 }
  0xd0   : > { %v2084_v9 = vpop.permute.xlu1 %806  ;;  %v2086_v19 = vpop.permute.xlu0 %790 }
  0xd2   : > { %812 = vrot.lane.b32.xlu1 %v2082_v8, %s1663_s14  ;;  %796 = vrot.lane.b32.xlu0 %v1756_v10, %s1663_s14 }
  0xd4   : > { %v859_v21 = vpop.permute.xlu1 %858  ;;  %v843_v45 = vpop.permute.xlu0 %842 }
  0xd6   : > { %611 = vrot.lane.b32.xlu1 %v580_v57, %s1659_s10  ;;  %595 = vrot.lane.b32.xlu0 %v560_v58, %s1659_s10  ;;  %v971_v57 = vsel %vm960_vm4, %v954_v35, %v602_v48  ;;  %v963_v58 = vsel %vm960_vm4, %v946_v33, %v586_v49  ;;  %v944_v33 = vsel %vm943_vm3, %v1746_v2, %v1952_v37 }
  0xd7   : > { %v988_v15 = vsel %vm977_vm5, %v971_v57, %v652_v13  ;;  %v980_v42 = vsel %vm977_vm5, %v963_v58, %v636_v14  ;;  %v952_v35 = vsel %vm943_vm3, %v1756_v10, %v1960_v39  ;;  %v682_v49 = vsel %vm451_vm0, %v680_v50, %v681_v46 }
  0xd8   : > { %v2094_v47 = vpop.permute.xlu1 %653  ;;  %v2096_v44 = vpop.permute.xlu0 %637  ;;  %v969_v48 = vsel %vm960_vm4, %v952_v35, %v1964_v40  ;;  %v734_v35 = vrot.slane %v2099_v43, 2 }
  0xd9   : > { %v986_v2 = vsel %vm977_vm5, %v969_v48, %v1992_v59 }
  0xda   : > { %659 = vrot.lane.b32.xlu1 %v2082_v8, %s1660_s11  ;;  %643 = vrot.lane.b32.xlu0 %v1756_v10, %s1660_s11  ;;  %v1003_v40 = vsel %vm994_vm6, %v986_v2, %v2008_v5 }
  0xdb   : > { %v1020_v50 = vsel %vm1011_vm7, %v1003_v40, %v2034_v25 }
  0xdc   : > { %v706_v27 = vpop.permute.xlu1 %705  ;;  %v690_v18 = vpop.permute.xlu0 %689 }
  0xdd   : > { %v2118_v34 = vsel %vm994_vm6, %v988_v15, %v706_v27  ;;  %v2121_v55 = vsel %vm994_vm6, %v980_v42, %v690_v18  ;;  %v961_v42 = vsel %vm960_vm4, %v944_v33, %v1966_v41  ;;  %v947_v15 = vsel %vm943_vm3, %v1801_v29, %v2045_v32 }
  0xde   : > { %814 = vrot.lane.b32.xlu1 %v2099_v43, %s1663_s14  ;;  %798 = vrot.lane.b32.xlu0 %v1751_v6, %s1663_s14  ;;  %v978_v10 = vsel %vm977_vm5, %v961_v42, %v1994_v60  ;;  %v1037_v60 = vsel %vm1028_vm8, %v1020_v50, %v2061_v61  ;;  %v733_v27 = vrot.slane %v2082_v8, 2  ;;  %v964_v33 = vsel %vm960_vm4, %v947_v15, %v2070_v12 }
  0xdf   : > { %v995_v41 = vsel %vm994_vm6, %v978_v10, %v2010_v7  ;;  %v2162_v7 = vld [vmem:[%s2077_s16 + $0x10] sm:$0x3]  ;;  %v1054_v25 = vsel %vm1045_vm9, %v1037_v60, %v859_v21  ;;  %v981_v32 = vsel %vm977_vm5, %v964_v33, %v2096_v44 }
  0xe0   : > { %v2142_v37 = vpop.permute.xlu1 %860  ;;  %v2144_v39 = vpop.permute.xlu0 %844  ;;  %v1012_v59 = vsel %vm1011_vm7, %v995_v41, %v2036_v30  ;;  %v683_v61 = vrot.slane %v2162_v7, 1 }
  0xe1   : > { %v1029_v5 = vsel %vm1028_vm8, %v1012_v59, %v2063_v62 }
  0xe2   : > { %866 = vrot.lane.b32.xlu1 %v682_v49, %s1664_s15  ;;  %850 = vrot.lane.b32.xlu0 %v1769_v17, %s1664_s15  ;;  %v1046_v13 = vsel %vm1045_vm9, %v1029_v5, %v843_v45  ;;  %v955_v45 = vsel %vm943_vm3, %v1798_v28, %v2043_v31  ;;  %v684_v31 = vsel %vm451_vm0, %v681_v46, %v683_v61 }
  0xe3   : > { %v972_v18 = vsel %vm960_vm4, %v955_v45, %v2068_v11  ;;  %v953_v46 = vsel %vm943_vm3, %v1751_v6, %v1958_v38 }
  0xe4   : > { %v912_v30 = vpop.permute.xlu1 %911  ;;  %v896_v14 = vpop.permute.xlu0 %895  ;;  %v989_v29 = vsel %vm977_vm5, %v972_v18, %v2094_v47 }
  0xe5   : > { %v1071_v57 = vsel %vm1062_vm10, %v1054_v25, %v912_v30  ;;  %v1063_v58 = vsel %vm1062_vm10, %v1046_v13, %v896_v14 }
  0xe6   : > { %661 = vrot.lane.b32.xlu1 %v2099_v43, %s1660_s11  ;;  %1540 = vmatprep.mubr.msk.f32.mxu1 %vm1091_vm11, %v1071_v57  ;;  %v970_v43 = vsel %vm960_vm4, %v953_v46, %v1982_v51  ;;  %v2500_v57 = vld [vmem:[#allocation6_spill] sm:$0xff] }
  0xe7   : > { %645 = vrot.lane.b32.xlu0 %v1751_v6, %s1660_s11  ;;  %1528 = vmatprep.mubr.msk.f32.mxu0 %vm1091_vm11, %v1063_v58  ;;  %v987_v6 = vsel %vm977_vm5, %v970_v43, %v2000_v63  ;;  %s1569_s11 = smul.u32 3, %s2522_s9 }
  0xe8   : > { %v517_v62 = vpop.permute.xlu1 %516  ;;  %v501_v21 = vpop.permute.xlu0 %500  ;;  %v1004_v51 = vsel %vm994_vm6, %v987_v6, %v2028_v22 }
  0xe9   : > { %v1021_v42 = vsel %vm1011_vm7, %v1004_v51, %v2055_v3  ;;  %s380_s17 = sadd.s32 %s1569_s11, %s1733_s27  ;;  %v956_v40 = vsel %vm943_vm3, %v1859_v52, %v517_v62 }
  0xea   : > { %713 = vrot.lane.b32.xlu1 %v682_v49, %s1661_s12  ;;  %v1038_v63 = vsel %vm1028_vm8, %v1021_v42, %v2084_v9  ;;  %v736_v9 = vrot.slane %v2162_v7, 2 }
  0xeb   : > { %697 = vrot.lane.b32.xlu0 %v1769_v17, %s1661_s12  ;;  %v945_v17 = vsel %vm943_vm3, %v1742_v0, %v1950_v36  ;;  %v735_v0 = vsel %vm540_vm1, %v733_v27, %v734_v35  ;;  %v1055_v22 = vsel %vm1045_vm9, %v1038_v63, %v2142_v37 }
  0xec   : > { %v708_v8 = vpop.permute.xlu1 %707  ;;  %v692_v48 = vpop.permute.xlu0 %691  ;;  %v962_v44 = vsel %vm960_vm4, %v945_v17, %v1984_v56 }
  0xed   : > { %v2197_v11 = vsel %vm994_vm6, %v989_v29, %v708_v8  ;;  %v2200_v12 = vsel %vm994_vm6, %v981_v32, %v692_v48  ;;  %v979_v36 = vsel %vm977_vm5, %v962_v44, %v2002_v1  ;;  %v2501_v29 = vld [vmem:[#allocation2_spill] sm:$0xff]  ;;  %v2502_v48 = vld [vmem:[#allocation3_spill] sm:$0xff] }
  0xee   : > { %868 = vrot.lane.b32.xlu1 %v684_v31, %s1664_s15  ;;  %v996_v56 = vsel %vm994_vm6, %v979_v36, %v2030_v23 }
  0xef   : > { %852 = vrot.lane.b32.xlu0 %v1766_v16, %s1664_s15  ;;  %v1013_v49 = vsel %vm1011_vm7, %v996_v56, %v2057_v4 }
  0xf0   : > { %v2224_v38 = vpop.permute.xlu1 %758  ;;  %v2226_v47 = vpop.permute.xlu0 %742  ;;  %v1030_v1 = vsel %vm1028_vm8, %v1013_v49, %v2086_v19  ;;  %v2504_v49 = vld [vmem:[#allocation5_spill] sm:$0xff] }
  0xf1   : > { %v1047_v23 = vsel %vm1045_vm9, %v1030_v1, %v2144_v39  ;;  %v737_v39 = vsel %vm540_vm1, %v734_v35, %v736_v9 }
  0xf2   : > { %919 = vrot.lane.b32.xlu1 %v735_v0, %s1665_s7 }
  0xf3   : > { %903 = vrot.lane.b32.xlu0 %v1778_v20, %s1665_s7 }
  0xf4   : > { %v914_v3 = vpop.permute.xlu1 %913  ;;  %v898_v4 = vpop.permute.xlu0 %897 }
  0xf5   : > { %v1072_v2 = vsel %vm1062_vm10, %v1055_v22, %v914_v3  ;;  %v1064_v10 = vsel %vm1062_vm10, %v1047_v23, %v898_v4 }
  0xf6   : > { %715 = vrot.lane.b32.xlu1 %v684_v31, %s1661_s12  ;;  %1541 = vmatmul.mubr.msk.f32.vlgmr.msra.gmra.mrb[0].mxu1 %vm1091_vm11, %v1072_v2  ;;  %v1022_v2 = vsel %vm1011_vm7, %v2118_v34, %v2224_v38 }
  0xf7   : > { %699 = vrot.lane.b32.xlu0 %v1766_v16, %s1661_s12  ;;  %1529 = vmatmul.mubr.msk.f32.vlgmr.msra.gmra.mrb[0].mxu0 %vm1091_vm11, %v1064_v10  ;;  %v948_v16 = vsel %vm943_vm3, %v1862_v53, %v501_v21  ;;  %s1460_s12 = sshll.u32 %s380_s17, 3  ;;  %v1014_v10 = vsel %vm1011_vm7, %v2121_v55, %v2226_v47 }
  0xf8   : > { %v519_v19 = vpop.permute.xlu1 %518  ;;  %v503_v37 = vpop.permute.xlu0 %502  ;;  %s382_s18 = scalar_lea.vmem %s2477_s2, %s1460_s12 }
  0xf9   : > { %v424_v52 = vld [vmem:[%s382_s18] sm:$0xff]  ;;  %v425_v25 = vld [vmem:[%s382_s18 + $0x8] sm:$0xff]  ;;  %v957_v14 = vsel %vm943_vm3, %v1872_v54, %v519_v19  ;;  %v949_v58 = vsel %vm943_vm3, %v2500_v57, %v503_v37  ;;  %v426_v61 = vld [vmem:[%s382_s18 + $0x10] sm:$0x3] }
  0xfa   : > { %766 = vrot.lane.b32.xlu1 %v735_v0, %s1662_s13  ;;  %v837_v13 = vrot.slane %v424_v52, 1  ;;  %v838_v30 = vrot.slane %v425_v25, 1  ;;  %v840_v15 = vrot.slane %v426_v61, 1  ;;  %v890_v35 = vrot.slane %v424_v52, 2  ;;  %v2503_v0 = vld [vmem:[#allocation4_spill] sm:$0xff] }
  0xfb   : > { %750 = vrot.lane.b32.xlu0 %v1778_v20, %s1662_s13  ;;  %v891_v31 = vrot.slane %v425_v25, 2  ;;  %v893_v46 = vrot.slane %v426_v61, 2 }
  0xfc   : > { %v606_v41 = vpop.permute.xlu1 %605  ;;  %v590_v50 = vpop.permute.xlu0 %589  ;;  %v841_v32 = vsel %vm451_vm0, %v838_v30, %v840_v15 }
  0xfd   : > { %v973_v59 = vsel %vm960_vm4, %v956_v40, %v606_v41  ;;  %v965_v60 = vsel %vm960_vm4, %v948_v16, %v590_v50  ;;  %v892_v17 = vsel %vm540_vm1, %v890_v35, %v891_v31  ;;  %v894_v6 = vsel %vm540_vm1, %v891_v31, %v893_v46 }
  0xfe   : > { %921 = vrot.lane.b32.xlu1 %v737_v39, %s1665_s7 }
  0xff   : > { %905 = vrot.lane.b32.xlu0 %v1785_v24, %s1665_s7 }
 0x100   : > { %v2271_v20 = vpop.permute.xlu1 %760  ;;  %v2273_v5 = vpop.permute.xlu0 %744 }
 0x102   : > { %768 = vrot.lane.b32.xlu1 %v737_v39, %s1662_s13 }
 0x103   : > { %752 = vrot.lane.b32.xlu0 %v1785_v24, %s1662_s13  ;;  %s1462_s13 = sshll.u32 %s2524_s25, 1 }
 0x104   : > { %v809_v53 = vpop.permute.xlu1 %808  ;;  %v793_v7 = vpop.permute.xlu0 %792 }
 0x105   : > { %v1039_v9 = vsel %vm1028_vm8, %v1022_v2, %v809_v53  ;;  %v1031_v19 = vsel %vm1028_vm8, %v1014_v10, %v793_v7  ;;  %v1023_v7 = vsel %vm1011_vm7, %v2197_v11, %v2271_v20  ;;  %v2505_v20 = vld [vmem:[#allocation7_spill] sm:$0xff] }
 0x106   : > { %816 = vrot.lane.b32.xlu1 %v424_v52, %s1663_s14 }
 0x107   : > { %800 = vrot.lane.b32.xlu0 %v1792_v26, %s1663_s14  ;;  %v839_v26 = vsel %vm451_vm0, %v837_v13, %v838_v30 }
 0x108   : > { %v608_v62 = vpop.permute.xlu1 %607  ;;  %v592_v24 = vpop.permute.xlu0 %591 }
 0x109   : > { %v974_v21 = vsel %vm960_vm4, %v957_v14, %v608_v62  ;;  %v966_v45 = vsel %vm960_vm4, %v949_v58, %v592_v24 }
 0x10a   : > { %818 = vrot.lane.b32.xlu1 %v425_v25, %s1663_s14  ;;  %v1015_v25 = vsel %vm1011_vm7, %v2200_v12, %v2273_v5 }
 0x10b   : > { %802 = vrot.lane.b32.xlu0 %v1798_v28, %s1663_s14  ;;  %s1463_s14 = sshll.u32 %s2520_s19, 5 }
 0x10c   : > { %v656_v27 = vpop.permute.xlu1 %655  ;;  %v640_v54 = vpop.permute.xlu0 %639 }
 0x10d   : > { %v990_v18 = vsel %vm977_vm5, %v973_v59, %v656_v27  ;;  %v982_v33 = vsel %vm977_vm5, %v965_v60, %v640_v54 }
 0x10e   : > { %870 = vrot.lane.b32.xlu1 %v839_v26, %s1664_s15 }
 0x10f   : > { %854 = vrot.lane.b32.xlu0 %v2501_v29, %s1664_s15 }
 0x110   : > { %v811_v8 = vpop.permute.xlu1 %810  ;;  %v795_v28 = vpop.permute.xlu0 %794 }
 0x111   : > { %v1040_v13 = vsel %vm1028_vm8, %v1023_v7, %v811_v8  ;;  %v1032_v30 = vsel %vm1028_vm8, %v1015_v25, %v795_v28 }
 0x112   : > { %872 = vrot.lane.b32.xlu1 %v841_v32, %s1664_s15 }
 0x113   : > { %856 = vrot.lane.b32.xlu0 %v2502_v48, %s1664_s15  ;;  %s393_s15 = sadd.s32 %s1463_s14, %s1462_s13 }
 0x114   : > { %v863_v43 = vpop.permute.xlu1 %862  ;;  %v847_v44 = vpop.permute.xlu0 %846 }
 0x115   : > { %v1056_v37 = vsel %vm1045_vm9, %v1039_v9, %v863_v43  ;;  %v1048_v39 = vsel %vm1045_vm9, %v1031_v19, %v847_v44 }
 0x116   : > { %923 = vrot.lane.b32.xlu1 %v892_v17, %s1665_s7 }
 0x117   : > { %907 = vrot.lane.b32.xlu0 %v2503_v0, %s1665_s7 }
 0x118   : > { %v658_v36 = vpop.permute.xlu1 %657  ;;  %v642_v51 = vpop.permute.xlu0 %641 }
 0x119   : > { %v991_v56 = vsel %vm977_vm5, %v974_v21, %v658_v36  ;;  %v983_v42 = vsel %vm977_vm5, %v966_v45, %v642_v51  ;;  %v2506_v21 = vld [vmem:[#allocation8_spill] sm:$0xff] }
 0x11a   : > { %925 = vrot.lane.b32.xlu1 %v894_v6, %s1665_s7 }
 0x11b   : > { %909 = vrot.lane.b32.xlu0 %v2504_v49, %s1665_s7  ;;  %s1464_s7 = sshll.u32 %s393_s15, 3 }
 0x11c   : > { %v710_v63 = vpop.permute.xlu1 %709  ;;  %v694_v1 = vpop.permute.xlu0 %693  ;;  %s2426_s6 = scalar_lea.vmem %s2480_s5, %s1464_s7 }
 0x11d   : > { %v2314_v22 = vsel %vm994_vm6, %v990_v18, %v710_v63  ;;  %v2317_v23 = vsel %vm994_vm6, %v982_v33, %v694_v1 }
 0x120   : > { %v865_v3 = vpop.permute.xlu1 %864  ;;  %v849_v4 = vpop.permute.xlu0 %848 }
 0x121   : > { %v1057_v14 = vsel %vm1045_vm9, %v1040_v13, %v865_v3  ;;  %v1049_v57 = vsel %vm1045_vm9, %v1032_v30, %v849_v4 }
 0x124   : > { %v916_v40 = vpop.permute.xlu1 %915  ;;  %v900_v16 = vpop.permute.xlu0 %899 }
 0x125   : > { %v1073_v41 = vsel %vm1062_vm10, %v1056_v37, %v916_v40  ;;  %v1065_v50 = vsel %vm1062_vm10, %v1048_v39, %v900_v16 }
 0x126   : > { %1531 = vmatprep.mubr.msk.f32.mxu0 %vm1091_vm11, %v1065_v50  ;;  %1543 = vmatprep.mubr.msk.f32.mxu1 %vm1091_vm11, %v1073_v41 }
 0x128   : > { %v521_v34 = vpop.permute.xlu1 %520  ;;  %v505_v55 = vpop.permute.xlu0 %504 }
 0x129   : > { %v958_v5 = vsel %vm943_vm3, %v2505_v20, %v521_v34  ;;  %v950_v45 = vsel %vm943_vm3, %v2506_v21, %v505_v55 }
 0x12c   : > { %v712_v38 = vpop.permute.xlu1 %711  ;;  %v696_v47 = vpop.permute.xlu0 %695 }
 0x12d   : > { %v1008_v59 = vsel %vm994_vm6, %v991_v56, %v712_v38  ;;  %v1000_v60 = vsel %vm994_vm6, %v983_v42, %v696_v47 }
 0x130   : > { %v763_v52 = vpop.permute.xlu1 %762  ;;  %v747_v53 = vpop.permute.xlu0 %746 }
 0x131   : > { %v1024_v42 = vsel %vm1011_vm7, %v2314_v22, %v763_v52  ;;  %v1016_v49 = vsel %vm1011_vm7, %v2317_v23, %v747_v53 }
 0x134   : > { %v918_v58 = vpop.permute.xlu1 %917  ;;  %v902_v61 = vpop.permute.xlu0 %901 }
 0x135   : > { %v1074_v62 = vsel %vm1062_vm10, %v1057_v14, %v918_v58  ;;  %v1066_v24 = vsel %vm1062_vm10, %v1049_v57, %v902_v61 }
 0x136   : > { %1532 = vmatmul.mubr.msk.f32.gmra.mrb[2].mxu0 %vm1091_vm11, %v1066_v24  ;;  %1544 = vmatmul.mubr.msk.f32.gmra.mrb[2].mxu1 %vm1091_vm11, %v1074_v62 }
 0x138   : > { %v2349_v11 = vpop.permute.xlu1 %522  ;;  %v2351_v12 = vpop.permute.xlu0 %506 }
 0x13c   : > { %v610_v26 = vpop.permute.xlu1 %609  ;;  %v594_v15 = vpop.permute.xlu0 %593 }
 0x13d   : > { %v975_v27 = vsel %vm960_vm4, %v958_v5, %v610_v26  ;;  %v967_v54 = vsel %vm960_vm4, %v950_v45, %v594_v15  ;;  %v2507_v5 = vld [vmem:[#allocation9_spill] sm:$0xff]  ;;  %v2508_v15 = vld [vmem:[#allocation10_spill] sm:$0xff] }
 0x13e   : > { %v959_v21 = vsel %vm943_vm3, %v2507_v5, %v2349_v11 }
 0x140   : > { %v765_v18 = vpop.permute.xlu1 %764  ;;  %v749_v33 = vpop.permute.xlu0 %748 }
 0x141   : > { %v1025_v40 = vsel %vm1011_vm7, %v1008_v59, %v765_v18  ;;  %v1017_v16 = vsel %vm1011_vm7, %v1000_v60, %v749_v33  ;;  %v951_v18 = vsel %vm943_vm3, %v2508_v15, %v2351_v12 }
 0x144   : > { %v813_v35 = vpop.permute.xlu1 %812  ;;  %v797_v31 = vpop.permute.xlu0 %796 }
 0x145   : > { %v1041_v63 = vsel %vm1028_vm8, %v1024_v42, %v813_v35  ;;  %v1033_v1 = vsel %vm1028_vm8, %v1016_v49, %v797_v31 }
 0x148   : > { %v612_v29 = vpop.permute.xlu1 %611  ;;  %v596_v32 = vpop.permute.xlu0 %595 }
 0x149   : > { %v968_v35 = vsel %vm960_vm4, %v951_v18, %v596_v32 }
 0x14c   : > { %v660_v8 = vpop.permute.xlu1 %659  ;;  %v644_v28 = vpop.permute.xlu0 %643 }
 0x14d   : > { %v992_v58 = vsel %vm977_vm5, %v975_v27, %v660_v8  ;;  %v984_v62 = vsel %vm977_vm5, %v967_v54, %v644_v28  ;;  %v976_v27 = vsel %vm960_vm4, %v959_v21, %v612_v29 }
 0x150   : > { %v815_v48 = vpop.permute.xlu1 %814  ;;  %v799_v17 = vpop.permute.xlu0 %798 }
 0x151   : > { %v1042_v41 = vsel %vm1028_vm8, %v1025_v40, %v815_v48  ;;  %v1034_v50 = vsel %vm1028_vm8, %v1017_v16, %v799_v17 }
 0x154   : > { %v867_v46 = vpop.permute.xlu1 %866  ;;  %v851_v43 = vpop.permute.xlu0 %850 }
 0x155   : > { %v1058_v3 = vsel %vm1045_vm9, %v1041_v63, %v867_v46  ;;  %v1050_v2 = vsel %vm1045_vm9, %v1033_v1, %v851_v43 }
 0x158   : > { %v662_v44 = vpop.permute.xlu1 %661 }
 0x159   : > { %v646_v0 = vpop.permute.xlu0 %645  ;;  %v993_v31 = vsel %vm977_vm5, %v976_v27, %v662_v44 }
 0x15a   : > { %v985_v48 = vsel %vm977_vm5, %v968_v35, %v646_v0 }
 0x15c   : > { %v714_v6 = vpop.permute.xlu1 %713 }
 0x15d   : > { %v698_v36 = vpop.permute.xlu0 %697  ;;  %v1009_v24 = vsel %vm994_vm6, %v992_v58, %v714_v6 }
 0x15e   : > { %v1001_v45 = vsel %vm994_vm6, %v984_v62, %v698_v36 }
 0x160   : > { %v869_v51 = vpop.permute.xlu1 %868 }
 0x161   : > { %v853_v56 = vpop.permute.xlu0 %852  ;;  %v1059_v34 = vsel %vm1045_vm9, %v1042_v41, %v869_v51 }
 0x162   : > { %v1051_v38 = vsel %vm1045_vm9, %v1034_v50, %v853_v56 }
 0x164   : > { %v920_v4 = vpop.permute.xlu1 %919 }
 0x165   : > { %v1075_v10 = vsel %vm1062_vm10, %v1058_v3, %v920_v4  ;;  %v904_v9 = vpop.permute.xlu0 %903  ;;  %v1465_v3 = vld [vmem:[%s2479_s4] ss:$0 sm:$0xff] }
 0x166   : > { %v1067_v19 = vsel %vm1062_vm10, %v1050_v2, %v904_v9  ;;  %1546 = vmatprep.mubr.msk.f32.mxu1 %vm1091_vm11, %v1075_v10 }
 0x167   : > { %1534 = vmatprep.mubr.msk.f32.mxu0 %vm1091_vm11, %v1067_v19 }
 0x168   : > { %v716_v22 = vpop.permute.xlu1 %715 }
 0x169   : > { %v700_v23 = vpop.permute.xlu0 %699  ;;  %v1010_v17 = vsel %vm994_vm6, %v993_v31, %v716_v22 }
 0x16a   : > { %v1002_v43 = vsel %vm994_vm6, %v985_v48, %v700_v23 }
 0x16c   : > { %v767_v37 = vpop.permute.xlu1 %766 }
 0x16d   : > { %v751_v39 = vpop.permute.xlu0 %750  ;;  %v1026_v26 = vsel %vm1011_vm7, %v1009_v24, %v767_v37 }
 0x16e   : > { %v1018_v33 = vsel %vm1011_vm7, %v1001_v45, %v751_v39 }
 0x170   : > { %v922_v55 = vpop.permute.xlu1 %921 }
 0x171   : > { %v1076_v47 = vsel %vm1062_vm10, %v1059_v34, %v922_v55  ;;  %v906_v52 = vpop.permute.xlu0 %905 }
 0x172   : > { %v1068_v53 = vsel %vm1062_vm10, %v1051_v38, %v906_v52  ;;  %1547 = vmatmul.mubr.msk.f32.gmra.mrb[4].mxu1 %vm1091_vm11, %v1076_v47 }
 0x173   : > { %1535 = vmatmul.mubr.msk.f32.gmra.mrb[4].mxu0 %vm1091_vm11, %v1068_v53 }
 0x174   : > { %v769_v59 = vpop.permute.xlu1 %768 }
 0x175   : > { %v753_v60 = vpop.permute.xlu0 %752  ;;  %v1027_v32 = vsel %vm1011_vm7, %v1010_v17, %v769_v59 }
 0x176   : > { %v1019_v0 = vsel %vm1011_vm7, %v1002_v43, %v753_v60 }
 0x178   : > { %v817_v7 = vpop.permute.xlu1 %816 }
 0x179   : > { %v801_v25 = vpop.permute.xlu0 %800  ;;  %v1043_v54 = vsel %vm1028_vm8, %v1026_v26, %v817_v7 }
 0x17a   : > { %v1035_v11 = vsel %vm1028_vm8, %v1018_v33, %v801_v25 }
 0x17c   : > { %v819_v13 = vpop.permute.xlu1 %818 }
 0x17d   : > { %v803_v30 = vpop.permute.xlu0 %802  ;;  %v1044_v6 = vsel %vm1028_vm8, %v1027_v32, %v819_v13 }
 0x17e   : > { %v1036_v36 = vsel %vm1028_vm8, %v1019_v0, %v803_v30 }
 0x180   : > { %v871_v14 = vpop.permute.xlu1 %870 }
 0x181   : > { %v855_v57 = vpop.permute.xlu0 %854  ;;  %v1060_v8 = vsel %vm1045_vm9, %v1043_v54, %v871_v14 }
 0x182   : > { %v1052_v12 = vsel %vm1045_vm9, %v1035_v11, %v855_v57 }
 0x184   : > { %v873_v61 = vpop.permute.xlu1 %872 }
 0x185   : > { %v857_v20 = vpop.permute.xlu0 %856  ;;  %v1061_v51 = vsel %vm1045_vm9, %v1044_v6, %v873_v61 }
 0x186   : > { %v1053_v42 = vsel %vm1045_vm9, %v1036_v36, %v857_v20 }
 0x188   : > { %v924_v28 = vpop.permute.xlu1 %923 }
 0x189   : > { %v1077_v29 = vsel %vm1062_vm10, %v1060_v8, %v924_v28  ;;  %v908_v46 = vpop.permute.xlu0 %907 }
 0x18a   : > { %v1069_v44 = vsel %vm1062_vm10, %v1052_v12, %v908_v46  ;;  %1549 = vmatprep.mubr.msk.f32.mxu1 %vm1091_vm11, %v1077_v29 }
 0x18b   : > { %1537 = vmatprep.mubr.msk.f32.mxu0 %vm1091_vm11, %v1069_v44 }
 0x18c   : > { %v926_v56 = vpop.permute.xlu1 %925 }
 0x18d   : > { %v1078_v49 = vsel %vm1062_vm10, %v1061_v51, %v926_v56  ;;  %v910_v63 = vpop.permute.xlu0 %909 }
 0x18e   : > { %v1070_v1 = vsel %vm1062_vm10, %v1053_v42, %v910_v63  ;;  %1550 = vmatmul.mubr.msk.f32.gmra.mrb[6].mxu1 %vm1091_vm11, %v1078_v49 }
 0x18f   : > { %1538 = vmatmul.mubr.msk.f32.gmra.mrb[6].mxu0 %vm1091_vm11, %v1070_v1 }
 0x1c9   : > { %v1542_v4 = vpop.f32.mrb[0].mxu1 }
 0x1ca   : > { %v1530_v2 = vpop.f32.mrb[0].mxu0  ;;  %v1256_v10 = vadd.f32 %v1542_v4, %v1465_v3  ;;  %v1250_v9 = vpop.f32.mrb[1].mxu1 }
 0x1cb   : > { %v1216_v19 = vadd.f32 %v1530_v2, %v1465_v3  ;;  %v1210_v22 = vpop.f32.mrb[1].mxu0  ;;  %v1251_v23 = vadd.f32 %v1465_v3, %v1250_v9 }
 0x1cc   : > { %1298 = vst.msk [vmem:[%s2426_s6 + $0x48] sm:$0xff] %vm1062_vm10, %v1256_v10  ;;  %v1211_v37 = vadd.f32 %v1465_v3, %v1210_v22 }
 0x1cd   : > { %1290 = vst.msk [vmem:[%s2426_s6 + $0x8] sm:$0xff] %vm1062_vm10, %v1216_v19  ;;  %1297 = vst.msk [vmem:[%s2426_s6 + $0x40] sm:$0xff] %vm1062_vm10, %v1251_v23 }
 0x1ce   : > { %1289 = vst.msk [vmem:[%s2426_s6] sm:$0xff] %vm1062_vm10, %v1211_v37 }
 0x209   : > { %v1533_v39 = vpop.f32.mrb[2].mxu0  ;;  %v1545_v40 = vpop.f32.mrb[2].mxu1 }
 0x20a   : > { %v1226_v16 = vadd.f32 %v1533_v39, %v1465_v3  ;;  %v1266_v41 = vadd.f32 %v1545_v40, %v1465_v3  ;;  %v1220_v50 = vpop.f32.mrb[3].mxu0  ;;  %v1260_v34 = vpop.f32.mrb[3].mxu1 }
 0x20b   : > { %v1221_v55 = vadd.f32 %v1465_v3, %v1220_v50  ;;  %v1261_v38 = vadd.f32 %v1465_v3, %v1260_v34 }
 0x20c   : > { %1292 = vst.msk [vmem:[%s2426_s6 + $0x18] sm:$0xff] %vm1062_vm10, %v1226_v16  ;;  %1300 = vst.msk [vmem:[%s2426_s6 + $0x58] sm:$0xff] %vm1062_vm10, %v1266_v41 }
 0x20d   : > { %1291 = vst.msk [vmem:[%s2426_s6 + $0x10] sm:$0xff] %vm1062_vm10, %v1221_v55  ;;  %1299 = vst.msk [vmem:[%s2426_s6 + $0x50] sm:$0xff] %vm1062_vm10, %v1261_v38 }
 0x245   : > { %v1548_v47 = vpop.f32.mrb[4].mxu1 }
 0x246   : > { %v1536_v52 = vpop.f32.mrb[4].mxu0  ;;  %v1276_v53 = vadd.f32 %v1548_v47, %v1465_v3  ;;  %v1270_v59 = vpop.f32.mrb[5].mxu1 }
 0x247   : > { %v1236_v60 = vadd.f32 %v1536_v52, %v1465_v3  ;;  %v1230_v7 = vpop.f32.mrb[5].mxu0  ;;  %v1271_v25 = vadd.f32 %v1465_v3, %v1270_v59 }
 0x248   : > { %1302 = vst.msk [vmem:[%s2426_s6 + $0x68] sm:$0xff] %vm1062_vm10, %v1276_v53  ;;  %v1231_v13 = vadd.f32 %v1465_v3, %v1230_v7 }
 0x249   : > { %1294 = vst.msk [vmem:[%s2426_s6 + $0x28] sm:$0xff] %vm1062_vm10, %v1236_v60  ;;  %1301 = vst.msk [vmem:[%s2426_s6 + $0x60] sm:$0xff] %vm1062_vm10, %v1271_v25 }
 0x24a   : > { %1293 = vst.msk [vmem:[%s2426_s6 + $0x20] sm:$0xff] %vm1062_vm10, %v1231_v13 }
 0x261   : > { %v1551_v30 = vpop.f32.mrb[6].mxu1 }
 0x262   : > { %v1539_v14 = vpop.f32.mrb[6].mxu0  ;;  %v1286_v57 = vadd.f32 %v1551_v30, %v1465_v3  ;;  %v1280_v58 = vpop.f32.mrb[7].mxu1 }
 0x263   : > { %v1246_v61 = vadd.f32 %v1539_v14, %v1465_v3  ;;  %v1240_v62 = vpop.f32.mrb[7].mxu0  ;;  %v1281_v24 = vadd.f32 %v1465_v3, %v1280_v58 }
 0x264   : > { %1304 = vst.msk [vmem:[%s2426_s6 + $0x78] sm:$0xff] %vm1062_vm10, %v1286_v57  ;;  %v1241_v20 = vadd.f32 %v1465_v3, %v1240_v62 }
 0x265   : > { %1296 = vst.msk [vmem:[%s2426_s6 + $0x38] sm:$0xff] %vm1062_vm10, %v1246_v61  ;;  %1303 = vst.msk [vmem:[%s2426_s6 + $0x70] sm:$0xff] %vm1062_vm10, %v1281_v24 }
 0x266   : > { %1295 = vst.msk [vmem:[%s2426_s6 + $0x30] sm:$0xff] %vm1062_vm10, %v1241_v20 }
 0x267 PF: > { %s15_s22 = sadd.s32 1, %s1656_s22   ;;  %s2509_s18 = smov %s1648_s20 }
 0x268   : > { %p12_p10 = scmp.ge.s32.totalorder %s15_s22, 6   ;;  %s2510_s19 = smov %s1652_s21 }
 0x269   : > { %s2511_s20 = smov %s2514_s23  ;;  %s2512_s21 = smov %s2518_s24 }
 0x26a   :  { %14 = sbr.rel (!%p12_p10) target bundleno = 3 (0x3), region = 76 }

</bundles_post_ra>
